<compile_context>
chip_gen: v7x
topology: tpu7x:2x2x1
jax: 0.10.0
libtpu: 0.0.40
codegen_flags: <defaults>
</compile_context>

<pallas_src>
import jax
import jax.numpy as jnp
from jax.experimental import pallas as pl
from jax.experimental.pallas import tpu as pltpu


# Static conv configuration implied by nn.Conv2d(3, 2, 2).
CIN, COUT, KH, KW = 3, 2, 2, 2


def conv2d_pallas(x_nchw, weight, bias):
    """Conv2d(3, 2, k=2, stride=1, pad=0) as a single fused Pallas kernel.

    x_nchw: [N, 3, H, W] f32
    weight: [2, 3, 2, 2] f32
    bias:   [2] f32
    returns [N, 2, H-1, W-1] f32 (NCHW)
    """
    N, Cin, H, W = x_nchw.shape
    Cout, _, kh, kw = weight.shape
    assert (Cin, Cout, kh, kw) == (CIN, COUT, KH, KW)
    OH, OW = H - KH + 1, W - KW + 1

    # Full-width flattened formulation: for j = oh*W + ow (ow over the FULL
    # width W)
    #   y[co, n, j] = b[co] + sum_{ci,r,c} w[co,ci,r,c] * x_flat[ci, n, j + r*W + c]
    # For ow < OW this is exactly the VALID conv output pixel (n, co, oh, ow);
    # the ow == W-1 column is garbage (wraps into the next row / zero pad) and
    # is sliced off in XLA below.  This keeps every tap a contiguous static
    # lane slice and makes both the input DMA and the output stores lane-dense.
    OHW = OH * W                              # lane-dense output row length (240)
    max_shift = (KH - 1) * W + (KW - 1)       # largest tap offset (17)

    # XLA-side layout plumbing (outside the kernel): [N,Cin,H,W] -> [Cin,N,H*W],
    # zero-pad the lane dim so the shifted slices of the discarded column stay
    # in bounds (valid outputs never read the padding).
    x_flat = jnp.transpose(x_nchw.astype(jnp.float32), (1, 0, 2, 3)).reshape(Cin, N, H * W)
    x_flat = jnp.pad(x_flat, ((0, 0), (0, 0), (0, max_shift)))

    w_flat = weight.reshape(-1).astype(jnp.float32)   # [Cout*Cin*KH*KW] = [24]
    b_flat = bias.reshape(-1).astype(jnp.float32)     # [Cout] = [2]

    def kernel(x_ref, w_ref, b_ref, o_ref):
        # x_ref: VMEM [Cin, N, H*W + max_shift]
        # w_ref: SMEM [Cout*Cin*KH*KW] flat f32 scalars
        # b_ref: SMEM [Cout]
        # o_ref: VMEM [Cout, N, OH*W]  (lane-dense output slab)
        accs = [None] * COUT
        for ci in range(CIN):
            for r in range(KH):
                for c in range(KW):
                    s = r * W + c
                    tap = x_ref[ci, :, s:s + OHW]          # [N, OHW], loaded once,
                    for co in range(COUT):                 # shared across both Cout
                        w_sc = w_ref[((co * CIN + ci) * KH + r) * KW + c]
                        term = w_sc * tap
                        accs[co] = term if accs[co] is None else accs[co] + term
        for co in range(COUT):
            # Bias scalar added once at the store; no full-slab bias broadcast.
            o_ref[co, :, :] = accs[co] + b_ref[co]

    out = pl.pallas_call(
        kernel,
        out_shape=jax.ShapeDtypeStruct((Cout, N, OHW), jnp.float32),
        in_specs=[
            pl.BlockSpec(memory_space=pltpu.MemorySpace.VMEM),   # whole x in VMEM
            pl.BlockSpec(memory_space=pltpu.MemorySpace.SMEM),   # weights as scalars
            pl.BlockSpec(memory_space=pltpu.MemorySpace.SMEM),   # bias as scalars
        ],
        out_specs=pl.BlockSpec(memory_space=pltpu.MemorySpace.VMEM),
    )(x_flat, w_flat, b_flat)

    # XLA-side relayout back to NCHW: drop the garbage last column, transpose.
    out = out.reshape(Cout, N, OH, W)[..., :OW]
    return jnp.transpose(out, (1, 0, 2, 3))


def mymodel_forward(x, weight, bias):
    """Faithful port of Mymodel.forward.

    In the PyTorch module the conv result is dead code and only x is returned,
    so the conv is not computed here at all (eligible for full DCE).  The conv
    hot path lives in `conv2d_pallas` for callers that actually need it.
    """
    del weight, bias
    return x


if __name__ == "__main__":
    key = jax.random.PRNGKey(0)
    k_x, k_w, k_b = jax.random.split(key, 3)

    # Shapes implied by Conv2d(3, 2, 2): N=2, Cin=3, H=W=16.
    x = jax.random.normal(k_x, (2, 3, 16, 16), dtype=jnp.float32)
    weight = jax.random.normal(k_w, (2, 3, 2, 2), dtype=jnp.float32) * 0.1
    bias = jax.random.normal(k_b, (2,), dtype=jnp.float32) * 0.1

    # 1) Module forward: returns x unchanged (conv is dead, exactly as in PyTorch).
    y = mymodel_forward(x, weight, bias)
    jax.block_until_ready(y)
    assert y.shape == x.shape
    assert bool(jnp.all(y == x))

    # 2) Exercise the fused Pallas conv kernel once (the Conv2d hot path) and
    #    validate it against a pure-JAX reference.
    conv_out = conv2d_pallas(x, weight, bias)
    jax.block_until_ready(conv_out)
    assert conv_out.shape == (2, 2, 15, 15)

    ref = jax.lax.conv_general_dilated(
        x, weight, window_strides=(1, 1), padding="VALID",
        dimension_numbers=("NCHW", "OIHW", "NCHW"),
    ) + bias.reshape(1, -1, 1, 1)
    assert bool(jnp.allclose(conv_out, ref, rtol=1e-5, atol=1e-5))

    print("KERNEL_OK")
</pallas_src>

<mosaic_0001>
module attributes {stable_mosaic.version = 11 : i64} {
  func.func @kernel(%arg0: memref<3x2x273xf32, #tpu.memory_space<vmem>>, %arg1: memref<24xf32, #tpu.memory_space<smem>>, %arg2: memref<2xf32, #tpu.memory_space<smem>>, %arg3: memref<2x2x240xf32, #tpu.memory_space<vmem>>) attributes {dimension_semantics = [], scalar_prefetch = 0 : i64, scratch_operands = 0 : i64, tpu.core_type = #tpu.core_type<tc>} {
    %c0 = arith.constant 0 : index
    %c0_0 = arith.constant 0 : index
    %c0_1 = arith.constant 0 : index
    %0 = vector.load %arg0[%c0, %c0_0, %c0_1] : memref<3x2x273xf32, #tpu.memory_space<vmem>>, vector<1x2x240xf32>
    %1 = vector.shape_cast %0 : vector<1x2x240xf32> to vector<2x240xf32>
    %c0_2 = arith.constant 0 : index
    %2 = memref.load %arg1[%c0_2] : memref<24xf32, #tpu.memory_space<smem>>
    %3 = vector.broadcast %2 : f32 to vector<2x240xf32>
    %4 = arith.mulf %3, %1 : vector<2x240xf32>
    %c12 = arith.constant 12 : index
    %5 = memref.load %arg1[%c12] : memref<24xf32, #tpu.memory_space<smem>>
    %6 = vector.broadcast %5 : f32 to vector<2x240xf32>
    %7 = arith.mulf %6, %1 : vector<2x240xf32>
    %c0_3 = arith.constant 0 : index
    %c0_4 = arith.constant 0 : index
    %c1 = arith.constant 1 : index
    %8 = vector.load %arg0[%c0_3, %c0_4, %c1] : memref<3x2x273xf32, #tpu.memory_space<vmem>>, vector<1x2x240xf32>
    %9 = vector.shape_cast %8 : vector<1x2x240xf32> to vector<2x240xf32>
    %c1_5 = arith.constant 1 : index
    %10 = memref.load %arg1[%c1_5] : memref<24xf32, #tpu.memory_space<smem>>
    %11 = vector.broadcast %10 : f32 to vector<2x240xf32>
    %12 = arith.mulf %11, %9 : vector<2x240xf32>
    %13 = arith.addf %4, %12 : vector<2x240xf32>
    %c13 = arith.constant 13 : index
    %14 = memref.load %arg1[%c13] : memref<24xf32, #tpu.memory_space<smem>>
    %15 = vector.broadcast %14 : f32 to vector<2x240xf32>
    %16 = arith.mulf %15, %9 : vector<2x240xf32>
    %17 = arith.addf %7, %16 : vector<2x240xf32>
    %c0_6 = arith.constant 0 : index
    %c0_7 = arith.constant 0 : index
    %c16 = arith.constant 16 : index
    %18 = vector.load %arg0[%c0_6, %c0_7, %c16] : memref<3x2x273xf32, #tpu.memory_space<vmem>>, vector<1x2x240xf32>
    %19 = vector.shape_cast %18 : vector<1x2x240xf32> to vector<2x240xf32>
    %c2 = arith.constant 2 : index
    %20 = memref.load %arg1[%c2] : memref<24xf32, #tpu.memory_space<smem>>
    %21 = vector.broadcast %20 : f32 to vector<2x240xf32>
    %22 = arith.mulf %21, %19 : vector<2x240xf32>
    %23 = arith.addf %13, %22 : vector<2x240xf32>
    %c14 = arith.constant 14 : index
    %24 = memref.load %arg1[%c14] : memref<24xf32, #tpu.memory_space<smem>>
    %25 = vector.broadcast %24 : f32 to vector<2x240xf32>
    %26 = arith.mulf %25, %19 : vector<2x240xf32>
    %27 = arith.addf %17, %26 : vector<2x240xf32>
    %c0_8 = arith.constant 0 : index
    %c0_9 = arith.constant 0 : index
    %c17 = arith.constant 17 : index
    %28 = vector.load %arg0[%c0_8, %c0_9, %c17] : memref<3x2x273xf32, #tpu.memory_space<vmem>>, vector<1x2x240xf32>
    %29 = vector.shape_cast %28 : vector<1x2x240xf32> to vector<2x240xf32>
    %c3 = arith.constant 3 : index
    %30 = memref.load %arg1[%c3] : memref<24xf32, #tpu.memory_space<smem>>
    %31 = vector.broadcast %30 : f32 to vector<2x240xf32>
    %32 = arith.mulf %31, %29 : vector<2x240xf32>
    %33 = arith.addf %23, %32 : vector<2x240xf32>
    %c15 = arith.constant 15 : index
    %34 = memref.load %arg1[%c15] : memref<24xf32, #tpu.memory_space<smem>>
    %35 = vector.broadcast %34 : f32 to vector<2x240xf32>
    %36 = arith.mulf %35, %29 : vector<2x240xf32>
    %37 = arith.addf %27, %36 : vector<2x240xf32>
    %c1_10 = arith.constant 1 : index
    %c0_11 = arith.constant 0 : index
    %c0_12 = arith.constant 0 : index
    %38 = vector.load %arg0[%c1_10, %c0_11, %c0_12] : memref<3x2x273xf32, #tpu.memory_space<vmem>>, vector<1x2x240xf32>
    %39 = vector.shape_cast %38 : vector<1x2x240xf32> to vector<2x240xf32>
    %c4 = arith.constant 4 : index
    %40 = memref.load %arg1[%c4] : memref<24xf32, #tpu.memory_space<smem>>
    %41 = vector.broadcast %40 : f32 to vector<2x240xf32>
    %42 = arith.mulf %41, %39 : vector<2x240xf32>
    %43 = arith.addf %33, %42 : vector<2x240xf32>
    %c16_13 = arith.constant 16 : index
    %44 = memref.load %arg1[%c16_13] : memref<24xf32, #tpu.memory_space<smem>>
    %45 = vector.broadcast %44 : f32 to vector<2x240xf32>
    %46 = arith.mulf %45, %39 : vector<2x240xf32>
    %47 = arith.addf %37, %46 : vector<2x240xf32>
    %c1_14 = arith.constant 1 : index
    %c0_15 = arith.constant 0 : index
    %c1_16 = arith.constant 1 : index
    %48 = vector.load %arg0[%c1_14, %c0_15, %c1_16] : memref<3x2x273xf32, #tpu.memory_space<vmem>>, vector<1x2x240xf32>
    %49 = vector.shape_cast %48 : vector<1x2x240xf32> to vector<2x240xf32>
    %c5 = arith.constant 5 : index
    %50 = memref.load %arg1[%c5] : memref<24xf32, #tpu.memory_space<smem>>
    %51 = vector.broadcast %50 : f32 to vector<2x240xf32>
    %52 = arith.mulf %51, %49 : vector<2x240xf32>
    %53 = arith.addf %43, %52 : vector<2x240xf32>
    %c17_17 = arith.constant 17 : index
    %54 = memref.load %arg1[%c17_17] : memref<24xf32, #tpu.memory_space<smem>>
    %55 = vector.broadcast %54 : f32 to vector<2x240xf32>
    %56 = arith.mulf %55, %49 : vector<2x240xf32>
    %57 = arith.addf %47, %56 : vector<2x240xf32>
    %c1_18 = arith.constant 1 : index
    %c0_19 = arith.constant 0 : index
    %c16_20 = arith.constant 16 : index
    %58 = vector.load %arg0[%c1_18, %c0_19, %c16_20] : memref<3x2x273xf32, #tpu.memory_space<vmem>>, vector<1x2x240xf32>
    %59 = vector.shape_cast %58 : vector<1x2x240xf32> to vector<2x240xf32>
    %c6 = arith.constant 6 : index
    %60 = memref.load %arg1[%c6] : memref<24xf32, #tpu.memory_space<smem>>
    %61 = vector.broadcast %60 : f32 to vector<2x240xf32>
    %62 = arith.mulf %61, %59 : vector<2x240xf32>
    %63 = arith.addf %53, %62 : vector<2x240xf32>
    %c18 = arith.constant 18 : index
    %64 = memref.load %arg1[%c18] : memref<24xf32, #tpu.memory_space<smem>>
    %65 = vector.broadcast %64 : f32 to vector<2x240xf32>
    %66 = arith.mulf %65, %59 : vector<2x240xf32>
    %67 = arith.addf %57, %66 : vector<2x240xf32>
    %c1_21 = arith.constant 1 : index
    %c0_22 = arith.constant 0 : index
    %c17_23 = arith.constant 17 : index
    %68 = vector.load %arg0[%c1_21, %c0_22, %c17_23] : memref<3x2x273xf32, #tpu.memory_space<vmem>>, vector<1x2x240xf32>
    %69 = vector.shape_cast %68 : vector<1x2x240xf32> to vector<2x240xf32>
    %c7 = arith.constant 7 : index
    %70 = memref.load %arg1[%c7] : memref<24xf32, #tpu.memory_space<smem>>
    %71 = vector.broadcast %70 : f32 to vector<2x240xf32>
    %72 = arith.mulf %71, %69 : vector<2x240xf32>
    %73 = arith.addf %63, %72 : vector<2x240xf32>
    %c19 = arith.constant 19 : index
    %74 = memref.load %arg1[%c19] : memref<24xf32, #tpu.memory_space<smem>>
    %75 = vector.broadcast %74 : f32 to vector<2x240xf32>
    %76 = arith.mulf %75, %69 : vector<2x240xf32>
    %77 = arith.addf %67, %76 : vector<2x240xf32>
    %c2_24 = arith.constant 2 : index
    %c0_25 = arith.constant 0 : index
    %c0_26 = arith.constant 0 : index
    %78 = vector.load %arg0[%c2_24, %c0_25, %c0_26] : memref<3x2x273xf32, #tpu.memory_space<vmem>>, vector<1x2x240xf32>
    %79 = vector.shape_cast %78 : vector<1x2x240xf32> to vector<2x240xf32>
    %c8 = arith.constant 8 : index
    %80 = memref.load %arg1[%c8] : memref<24xf32, #tpu.memory_space<smem>>
    %81 = vector.broadcast %80 : f32 to vector<2x240xf32>
    %82 = arith.mulf %81, %79 : vector<2x240xf32>
    %83 = arith.addf %73, %82 : vector<2x240xf32>
    %c20 = arith.constant 20 : index
    %84 = memref.load %arg1[%c20] : memref<24xf32, #tpu.memory_space<smem>>
    %85 = vector.broadcast %84 : f32 to vector<2x240xf32>
    %86 = arith.mulf %85, %79 : vector<2x240xf32>
    %87 = arith.addf %77, %86 : vector<2x240xf32>
    %c2_27 = arith.constant 2 : index
    %c0_28 = arith.constant 0 : index
    %c1_29 = arith.constant 1 : index
    %88 = vector.load %arg0[%c2_27, %c0_28, %c1_29] : memref<3x2x273xf32, #tpu.memory_space<vmem>>, vector<1x2x240xf32>
    %89 = vector.shape_cast %88 : vector<1x2x240xf32> to vector<2x240xf32>
    %c9 = arith.constant 9 : index
    %90 = memref.load %arg1[%c9] : memref<24xf32, #tpu.memory_space<smem>>
    %91 = vector.broadcast %90 : f32 to vector<2x240xf32>
    %92 = arith.mulf %91, %89 : vector<2x240xf32>
    %93 = arith.addf %83, %92 : vector<2x240xf32>
    %c21 = arith.constant 21 : index
    %94 = memref.load %arg1[%c21] : memref<24xf32, #tpu.memory_space<smem>>
    %95 = vector.broadcast %94 : f32 to vector<2x240xf32>
    %96 = arith.mulf %95, %89 : vector<2x240xf32>
    %97 = arith.addf %87, %96 : vector<2x240xf32>
    %c2_30 = arith.constant 2 : index
    %c0_31 = arith.constant 0 : index
    %c16_32 = arith.constant 16 : index
    %98 = vector.load %arg0[%c2_30, %c0_31, %c16_32] : memref<3x2x273xf32, #tpu.memory_space<vmem>>, vector<1x2x240xf32>
    %99 = vector.shape_cast %98 : vector<1x2x240xf32> to vector<2x240xf32>
    %c10 = arith.constant 10 : index
    %100 = memref.load %arg1[%c10] : memref<24xf32, #tpu.memory_space<smem>>
    %101 = vector.broadcast %100 : f32 to vector<2x240xf32>
    %102 = arith.mulf %101, %99 : vector<2x240xf32>
    %103 = arith.addf %93, %102 : vector<2x240xf32>
    %c22 = arith.constant 22 : index
    %104 = memref.load %arg1[%c22] : memref<24xf32, #tpu.memory_space<smem>>
    %105 = vector.broadcast %104 : f32 to vector<2x240xf32>
    %106 = arith.mulf %105, %99 : vector<2x240xf32>
    %107 = arith.addf %97, %106 : vector<2x240xf32>
    %c2_33 = arith.constant 2 : index
    %c0_34 = arith.constant 0 : index
    %c17_35 = arith.constant 17 : index
    %108 = vector.load %arg0[%c2_33, %c0_34, %c17_35] : memref<3x2x273xf32, #tpu.memory_space<vmem>>, vector<1x2x240xf32>
    %109 = vector.shape_cast %108 : vector<1x2x240xf32> to vector<2x240xf32>
    %c11 = arith.constant 11 : index
    %110 = memref.load %arg1[%c11] : memref<24xf32, #tpu.memory_space<smem>>
    %111 = vector.broadcast %110 : f32 to vector<2x240xf32>
    %112 = arith.mulf %111, %109 : vector<2x240xf32>
    %113 = arith.addf %103, %112 : vector<2x240xf32>
    %c23 = arith.constant 23 : index
    %114 = memref.load %arg1[%c23] : memref<24xf32, #tpu.memory_space<smem>>
    %115 = vector.broadcast %114 : f32 to vector<2x240xf32>
    %116 = arith.mulf %115, %109 : vector<2x240xf32>
    %117 = arith.addf %107, %116 : vector<2x240xf32>
    %c0_36 = arith.constant 0 : index
    %118 = memref.load %arg2[%c0_36] : memref<2xf32, #tpu.memory_space<smem>>
    %119 = vector.broadcast %118 : f32 to vector<2x240xf32>
    %120 = arith.addf %113, %119 : vector<2x240xf32>
    %c0_37 = arith.constant 0 : index
    %c0_38 = arith.constant 0 : index
    %c0_39 = arith.constant 0 : index
    %121 = vector.load %arg3[%c0_37, %c0_38, %c0_39] : memref<2x2x240xf32, #tpu.memory_space<vmem>>, vector<1x2x240xf32>
    %122 = vector.shape_cast %121 : vector<1x2x240xf32> to vector<2x240xf32>
    %123 = vector.shape_cast %120 : vector<2x240xf32> to vector<1x2x240xf32>
    tpu.vector_store %arg3[%c0_37, %c0_38, %c0_39], %123 {strides = array<i32>} : memref<2x2x240xf32, #tpu.memory_space<vmem>>, vector<1x2x240xf32>,
    %c1_40 = arith.constant 1 : index
    %124 = memref.load %arg2[%c1_40] : memref<2xf32, #tpu.memory_space<smem>>
    %125 = vector.broadcast %124 : f32 to vector<2x240xf32>
    %126 = arith.addf %117, %125 : vector<2x240xf32>
    %c1_41 = arith.constant 1 : index
    %c0_42 = arith.constant 0 : index
    %c0_43 = arith.constant 0 : index
    %127 = vector.load %arg3[%c1_41, %c0_42, %c0_43] : memref<2x2x240xf32, #tpu.memory_space<vmem>>, vector<1x2x240xf32>
    %128 = vector.shape_cast %127 : vector<1x2x240xf32> to vector<2x240xf32>
    %129 = vector.shape_cast %126 : vector<2x240xf32> to vector<1x2x240xf32>
    tpu.vector_store %arg3[%c1_41, %c0_42, %c0_43], %129 {strides = array<i32>} : memref<2x2x240xf32, #tpu.memory_space<vmem>>, vector<1x2x240xf32>,
    return
  }
}

</mosaic_0001>

<bundles_post_ra>
// kernel: tpu_custom_call.1
= control target key start
LH: loop header
LB: loop body
LE: loop exit
PB: predicated region body
PF: predicated region fallthrough
CT: control target
= control target key end

     0   :  { %8 = vsyncpa [#allocation3], 0  ;;  %s530_s0 = inlined_call_operand.hbm [shape: f32[3,2,273], index: 0, kind: input, shape index: {}]   ;;  %s531_s1 = inlined_call_operand.vmem [shape: f32[24], index: 1, kind: input, shape index: {}]   ;;  %s532_s2 = inlined_call_operand.vmem [shape: f32[2], index: 2, kind: input, shape index: {}]   ;;  %s533_s3 = inlined_call_operand.hbm [shape: f32[2,2,240], index: 3, kind: output, shape index: {}]  }
   0x1   :  { %9 = vsyncpa [#allocation5], 0 }
   0x2   :  { %10 = vsyncpa [#allocation8], 0 }
   0x3   :  { %11 = vsyncpa [#allocation4], 0  ;;  %s409_s12 = smov [#allocation2]   ;;  %s30_s16 = sshll.u32 %s531_s1, 4  ;;  %s31_s16 = int_to_ptr.vmem [resolvable:$true] %s30_s16 }
   0x4   :  { %s17_s13 = sshll.u32 %s409_s12, 4  ;;  %s333_s19 = scalar_lea.hbm %s530_s0, 288  ;;  %s18_s13 = int_to_ptr.vmem [resolvable:$true] %s17_s13 }
   0x5   :  { %p334_p0 = scmp.ne.s32.totalorder %s530_s0, %s333_s19  ;;  %p337_p1 = scmp.lt.u32.totalorder %s333_s19, %s530_s0 }
   0x7   :  { %p339_p2 = pnand %p337_p1, %p334_p0 }
   0x9   :  { %342 = shalt.err (!%p339_p2)
}
   0xa   :  { %s343_s24 = scalar_lea.vmem %s18_s13, 288  ;;  %p348_p4 = scmp.lt.s32.totalorder %s18_s13, %s18_s13 }
   0xb   :  { %p344_p3 = scmp.ne.s32.totalorder %s18_s13, %s343_s24  ;;  %p349_p5 = scmp.lt.s32.totalorder %s343_s24, %s343_s24 }
   0xd   :  { %p350_p6 = por %p349_p5, %p348_p4 }
   0xf   :  { %p351_p7 = pnand %p350_p6, %p344_p3 }
  0x11   :  { %354 = shalt.err (!%p351_p7)
}
  0x12   :  { %s410_s1 = smov 96   ;;  %s411_s25 = smov 6  }
  0x13   :  { %23 = dma.hbm_to_vmem [thread:$0]  %s530_s0, 288, %s18_s13, [#allocation3], %s410_s1, %s410_s1, %s411_s25  }
  0x14   :  { %s355_s28 = scalar_lea.vmem %s31_s16, 16  ;;  %p360_p9 = scmp.lt.s32.totalorder %s31_s16, %s31_s16 }
  0x15   :  { %p356_p8 = scmp.ne.s32.totalorder %s31_s16, %s355_s28  ;;  %p361_p10 = scmp.lt.s32.totalorder %s355_s28, %s355_s28 }
  0x17   :  { %p362_p11 = por %p361_p10, %p360_p9 }
  0x19   :  { %p363_p12 = pnand %p362_p11, %p356_p8 }
  0x1b   :  { %366 = shalt.err (!%p363_p12)
}
  0x1c   :  { %s412_s29 = smov [#allocation6]   ;;  %s40_s5 = sshll.u32 %s532_s2, 4  ;;  %s41_s5 = int_to_ptr.vmem [resolvable:$true] %s40_s5 }
  0x1d   :  { %33 = dma.vmem_to_smem %s31_s16, 16, %s412_s29, [#allocation5]  }
  0x1e   :  { %s367_s6 = scalar_lea.vmem %s41_s5, 16  ;;  %p372_p0 = scmp.lt.s32.totalorder %s41_s5, %s41_s5 }
  0x1f   :  { %p368_p13 = scmp.ne.s32.totalorder %s41_s5, %s367_s6  ;;  %p373_p1 = scmp.lt.s32.totalorder %s367_s6, %s367_s6 }
  0x21   :  { %p374_p2 = por %p373_p1, %p372_p0 }
  0x23   :  { %p375_p3 = pnand %p374_p2, %p368_p13 }
  0x25   :  { %378 = shalt.err (!%p375_p3)
}
  0x26   :  { %s413_s0 = smov [#allocation7]  }
  0x27   :  { %43 = dma.vmem_to_smem %s41_s5, 16, %s413_s0, [#allocation8]  }
  0x28   :  { %401 = dma.done.wait [#allocation3], 288  }
  0x29   :  { %402 = vsyncadd [#allocation3], 4294967008 }
  0x2a   :  { %403 = dma.done.wait [#allocation5], 16  }
  0x2b   :  { %404 = vsyncadd [#allocation5], 4294967280 }
  0x2c   :  { %405 = dma.done.wait [#allocation8], 16  }
  0x2d   :  { %406 = vsyncadd [#allocation8], 4294967280 }
  0x2e   :  { %53 = sfence }
  0x2f   :  { %s301_s7 = sld [smem:[#allocation6 + $0x2]]  ;;  %s299_s8 = sld [smem:[#allocation6 + $0x1]]  ;;  %v458_v0 = vld [vmem:[#allocation2] sm:$0xf]  ;;  %v468_v14 = vld [vmem:[#allocation2 + $0x6] sm:$0xf] }
  0x30   :  { %s302_s2 = sld [smem:[#allocation6 + $0xe]]  ;;  %s300_s9 = sld [smem:[#allocation6 + $0xd]]  ;;  %v103_v9 = vld [vmem:[#allocation2] sm:$0x3f]  ;;  %v175_v23 = vld [vmem:[#allocation2 + $0x6] sm:$0x3f] }
  0x31   :  { %s304_s10 = sld [smem:[#allocation6 + $0xf]]  ;;  %s303_s11 = sld [smem:[#allocation6 + $0x3]]  ;;  %v480_v28 = vld [vmem:[#allocation2 + $0xc] sm:$0xf]  ;;  %vm68_vm0 = vcmask 1039360   ;;  %vm89_vm1 = vcmask 916480  }
  0x32   :  { %s308_s12 = sld [smem:[#allocation6 + $0x11]]  ;;  %s307_s13 = sld [smem:[#allocation6 + $0x5]]  ;;  %v246_v37 = vld [vmem:[#allocation2 + $0xc] sm:$0x3f]  ;;  %vm111_vm2 = vcmask 908288   ;;  %vm270_vm3 = vcmask 1041408  }
  0x33   :  { %s414_s14 = smov 112   ;;  %s415_s15 = smov 127   ;;  %vm271_vm4 = vcmask 912386  }
  0x34   :  { %s310_s16 = sld [smem:[#allocation6 + $0x12]]  ;;  %s309_s17 = sld [smem:[#allocation6 + $0x6]]  ;;  %vm272_vm5 = vmor %vm271_vm4, %vm270_vm3 }
  0x35   :  { %v83_v1 = vstv %s301_s7  ;;  %v62_v3 = vstv %s299_s8  ;;  %s312_s18 = sld [smem:[#allocation6 + $0x13]]  ;;  %s311_s19 = sld [smem:[#allocation6 + $0x7]] }
  0x36   :  { %v84_v2 = vmul.f32 %v83_v1, %v458_v0  ;;  %v63_v4 = vmul.f32 %v62_v3, %v458_v0  ;;  %v94_v5 = vstv %s302_s2  ;;  %v73_v6 = vstv %s300_s9  ;;  %s416_s20 = smov 111   ;;  %s316_s21 = sld [smem:[#allocation6 + $0x15]] }
  0x37   :  { %v95_v7 = vmul.f32 %v94_v5, %v458_v0  ;;  %v74_v8 = vmul.f32 %v73_v6, %v458_v0  ;;  %v116_v10 = vstv %s304_s10  ;;  %v105_v11 = vstv %s303_s11  ;;  %s315_s22 = sld [smem:[#allocation6 + $0x9]]  ;;  %s318_s23 = sld [smem:[#allocation6 + $0x16]] }
  0x38   :  { %86 = vrot.lane.b32.xlu1 %v84_v2, %s414_s14  ;;  %65 = vrot.lane.b32.xlu0 %v63_v4, %s415_s15  ;;  %v117_v12 = vmul.f32 %v116_v10, %v103_v9  ;;  %v106_v13 = vmul.f32 %v105_v11, %v103_v9  ;;  %v146_v15 = vstv %s308_s12  ;;  %v136_v16 = vstv %s307_s13  ;;  %s317_s24 = sld [smem:[#allocation6 + $0xa]]  ;;  %s320_s1 = sld [smem:[#allocation6 + $0x17]] }
  0x39   :  { %v147_v17 = vmul.f32 %v146_v15, %v468_v14  ;;  %v137_v18 = vmul.f32 %v136_v16, %v468_v14  ;;  %s319_s25 = sld [smem:[#allocation6 + $0xb]]  ;;  %s55_s26 = sld [smem:[#allocation6]] }
  0x3a   :  { %v166_v19 = vstv %s310_s16  ;;  %v156_v20 = vstv %s309_s17  ;;  %s298_s27 = sld [smem:[#allocation6 + $0xc]]  ;;  %s306_s28 = sld [smem:[#allocation6 + $0x10]] }
  0x3b   :  { %v167_v21 = vmul.f32 %v166_v19, %v468_v14  ;;  %v157_v22 = vmul.f32 %v156_v20, %v468_v14  ;;  %v187_v24 = vstv %s312_s18  ;;  %v177_v25 = vstv %s311_s19  ;;  %s305_s29 = sld [smem:[#allocation6 + $0x4]]  ;;  %s313_s4 = sld [smem:[#allocation6 + $0x8]] }
  0x3c   :  { %97 = vrot.lane.b32.xlu1 %v95_v7, %s414_s14  ;;  %76 = vrot.lane.b32.xlu0 %v74_v8, %s415_s15  ;;  %v188_v26 = vmul.f32 %v187_v24, %v175_v23  ;;  %v178_v27 = vmul.f32 %v177_v25, %v175_v23  ;;  %v217_v29 = vstv %s316_s21  ;;  %s314_s30 = sld [smem:[#allocation6 + $0x14]]  ;;  %s321_s5 = sld [smem:[#allocation7 + $0x1]] }
  0x3d   :  { %v207_v30 = vstv %s315_s22  ;;  %v218_v31 = vmul.f32 %v217_v29, %v480_v28  ;;  %v237_v33 = vstv %s318_s23  ;;  %s267_s6 = sld [smem:[#allocation7]]  ;;  %s417_s0 = smov [#allocation9]  }
  0x3e   :  { %v208_v32 = vmul.f32 %v207_v30, %v480_v28  ;;  %v227_v34 = vstv %s317_s24  ;;  %v238_v35 = vmul.f32 %v237_v33, %v480_v28  ;;  %v258_v38 = vstv %s320_s1  ;;  %s284_s7 = sshll.u32 %s417_s0, 4  ;;  %s285_s7 = int_to_ptr.vmem [resolvable:$true] %s284_s7 }
  0x3f   :  { %v228_v36 = vmul.f32 %v227_v34, %v480_v28  ;;  %v248_v39 = vstv %s319_s25  ;;  %v259_v40 = vmul.f32 %v258_v38, %v246_v37  ;;  %v56_v43 = vstv %s55_s26  ;;  %s379_s8 = scalar_lea.vmem %s285_s7, 128  ;;  %p384_p5 = scmp.lt.s32.totalorder %s285_s7, %s285_s7 }
  0x40   :  { %119 = vrot.lane.b32.xlu1 %v117_v12, %s416_s20  ;;  %108 = vrot.lane.b32.xlu0 %v106_v13, %s416_s20  ;;  %v249_v41 = vmul.f32 %v248_v39, %v246_v37  ;;  %v59_v46 = vstv %s298_s27  ;;  %v57_v47 = vmul.f32 %v56_v43, %v458_v0  ;;  %v132_v56 = vstv %s306_s28  ;;  %p380_p4 = scmp.ne.s32.totalorder %s285_s7, %s379_s8  ;;  %p385_p6 = scmp.lt.s32.totalorder %s379_s8, %s379_s8 }
  0x41   :  { %v60_v51 = vmul.f32 %v59_v46, %v458_v0  ;;  %v128_v59 = vstv %s305_s29  ;;  %v133_v0 = vmul.f32 %v132_v56, %v468_v14 }
  0x42   :  { %v129_v6 = vmul.f32 %v128_v59, %v468_v14  ;;  %v203_v23 = vstv %s314_s30  ;;  %p386_p7 = por %p385_p6, %p384_p5 }
  0x43   :  { %v204_v34 = vmul.f32 %v203_v23, %v480_v28 }
  0x44   :  { %149 = vrot.lane.b32.xlu1 %v147_v17, %s415_s15  ;;  %139 = vrot.lane.b32.xlu0 %v137_v18, %s415_s15  ;;  %p387_p8 = pnand %p386_p7, %p380_p4 }
  0x48   :  { %169 = vrot.lane.b32.xlu1 %v167_v21, %s414_s14  ;;  %159 = vrot.lane.b32.xlu0 %v157_v22, %s414_s14 }
  0x4c   :  { %190 = vrot.lane.b32.xlu1 %v188_v26, %s416_s20  ;;  %180 = vrot.lane.b32.xlu0 %v178_v27, %s416_s20  ;;  %v199_v27 = vstv %s313_s4 }
  0x4d   :  { %v200_v37 = vmul.f32 %v199_v27, %v480_v28 }
  0x50   :  { %220 = vrot.lane.b32.xlu1 %v218_v31, %s415_s15  ;;  %210 = vrot.lane.b32.xlu0 %v208_v32, %s415_s15 }
  0x54   :  { %240 = vrot.lane.b32.xlu1 %v238_v35, %s414_s14  ;;  %230 = vrot.lane.b32.xlu0 %v228_v36, %s414_s14 }
  0x58   :  { %261 = vrot.lane.b32.xlu1 %v259_v40, %s416_s20  ;;  %251 = vrot.lane.b32.xlu0 %v249_v41, %s416_s20 }
  0xaa   :  { %v87_v42 = vpop.permute.xlu1 %86  ;;  %v66_v44 = vpop.permute.xlu0 %65 }
  0xab   :  { %v67_v45 = vrot.slane %v66_v44, 2  ;;  %v88_v52 = vrot.slane %v87_v42, 2 }
  0xad   :  { %v69_v48 = vsel %vm68_vm0, %v66_v44, %v67_v45  ;;  %v90_v63 = vsel %vm89_vm1, %v87_v42, %v88_v52 }
  0xae   :  { %v98_v49 = vpop.permute.xlu1 %97  ;;  %v77_v50 = vpop.permute.xlu0 %76  ;;  %v71_v55 = vadd.f32 %v69_v48, %v57_v47 }
  0xaf   :  { %v99_v53 = vrot.slane %v98_v49, 2  ;;  %v78_v54 = vrot.slane %v77_v50, 2 }
  0xb0   :  { %v92_v5 = vadd.f32 %v90_v63, %v71_v55 }
  0xb1   :  { %v79_v57 = vsel %vm68_vm0, %v77_v50, %v78_v54  ;;  %v100_v1 = vsel %vm89_vm1, %v98_v49, %v99_v53 }
  0xb2   :  { %v120_v58 = vpop.permute.xlu1 %119  ;;  %v81_v60 = vadd.f32 %v79_v57, %v60_v51  ;;  %v109_v62 = vpop.permute.xlu0 %108 }
  0xb3   :  { %v121_v61 = vrot.slane %v120_v58, 2  ;;  %v110_v2 = vrot.slane %v109_v62, 2 }
  0xb4   :  { %v102_v3 = vadd.f32 %v100_v1, %v81_v60 }
  0xb5   :  { %v122_v4 = vsel %vm111_vm2, %v120_v58, %v121_v61  ;;  %v112_v7 = vsel %vm111_vm2, %v109_v62, %v110_v2  ;;  %v275_v62 = vstv %s321_s5  ;;  %v268_v2 = vstv %s267_s6 }
  0xb6   :  { %v150_v8 = vpop.permute.xlu1 %149  ;;  %v124_v9 = vadd.f32 %v122_v4, %v102_v3  ;;  %v114_v10 = vadd.f32 %v112_v7, %v92_v5  ;;  %v140_v12 = vpop.permute.xlu0 %139 }
  0xb7   :  { %v151_v11 = vrot.slane %v150_v8, 2  ;;  %v141_v13 = vrot.slane %v140_v12, 2 }
  0xb8   :  { %v134_v15 = vadd.f32 %v133_v0, %v124_v9  ;;  %v130_v16 = vadd.f32 %v129_v6, %v114_v10 }
  0xb9   :  { %v152_v18 = vsel %vm68_vm0, %v150_v8, %v151_v11  ;;  %v142_v21 = vsel %vm68_vm0, %v140_v12, %v141_v13 }
  0xba   :  { %v170_v17 = vpop.permute.xlu1 %169  ;;  %v160_v20 = vpop.permute.xlu0 %159  ;;  %v154_v24 = vadd.f32 %v152_v18, %v134_v15  ;;  %v144_v29 = vadd.f32 %v142_v21, %v130_v16 }
  0xbb   :  { %v171_v19 = vrot.slane %v170_v17, 2  ;;  %v161_v14 = vrot.slane %v160_v20, 2 }
  0xbd   :  { %v172_v22 = vsel %vm89_vm1, %v170_v17, %v171_v19  ;;  %v162_v25 = vsel %vm89_vm1, %v160_v20, %v161_v14 }
  0xbe   :  { %v191_v26 = vpop.permute.xlu1 %190  ;;  %v181_v31 = vpop.permute.xlu0 %180  ;;  %v174_v32 = vadd.f32 %v172_v22, %v154_v24  ;;  %v164_v35 = vadd.f32 %v162_v25, %v144_v29 }
  0xbf   :  { %v192_v30 = vrot.slane %v191_v26, 2  ;;  %v182_v33 = vrot.slane %v181_v31, 2 }
  0xc1   :  { %v193_v36 = vsel %vm111_vm2, %v191_v26, %v192_v30  ;;  %v183_v39 = vsel %vm111_vm2, %v181_v31, %v182_v33 }
  0xc2   :  { %v195_v38 = vadd.f32 %v193_v36, %v174_v32  ;;  %v221_v40 = vpop.permute.xlu1 %220  ;;  %v185_v41 = vadd.f32 %v183_v39, %v164_v35  ;;  %v211_v43 = vpop.permute.xlu0 %210 }
  0xc3   :  { %v222_v42 = vrot.slane %v221_v40, 2  ;;  %v212_v45 = vrot.slane %v211_v43, 2 }
  0xc4   :  { %v205_v44 = vadd.f32 %v204_v34, %v195_v38  ;;  %v201_v46 = vadd.f32 %v200_v37, %v185_v41 }
  0xc5   :  { %v223_v48 = vsel %vm68_vm0, %v221_v40, %v222_v42  ;;  %v213_v51 = vsel %vm68_vm0, %v211_v43, %v212_v45 }
  0xc6   :  { %v241_v47 = vpop.permute.xlu1 %240  ;;  %v231_v50 = vpop.permute.xlu0 %230  ;;  %v225_v53 = vadd.f32 %v223_v48, %v205_v44  ;;  %v215_v56 = vadd.f32 %v213_v51, %v201_v46 }
  0xc7   :  { %v242_v49 = vrot.slane %v241_v47, 2  ;;  %v232_v28 = vrot.slane %v231_v50, 2 }
  0xc9   :  { %v243_v52 = vsel %vm89_vm1, %v241_v47, %v242_v49  ;;  %v233_v54 = vsel %vm89_vm1, %v231_v50, %v232_v28 }
  0xca   :  { %v262_v55 = vpop.permute.xlu1 %261  ;;  %v252_v58 = vpop.permute.xlu0 %251  ;;  %v245_v59 = vadd.f32 %v243_v52, %v225_v53  ;;  %v235_v61 = vadd.f32 %v233_v54, %v215_v56 }
  0xcb   :  { %v263_v57 = vrot.slane %v262_v55, 2  ;;  %v253_v60 = vrot.slane %v252_v58, 2 }
  0xcd   :  { %v264_v63 = vsel %vm111_vm2, %v262_v55, %v263_v57  ;;  %v254_v0 = vsel %vm111_vm2, %v252_v58, %v253_v60 }
  0xce   :  { %v266_v1 = vadd.f32 %v264_v63, %v245_v59  ;;  %v256_v3 = vadd.f32 %v254_v0, %v235_v61 }
  0xd0   :  { %v276_v4 = vadd.f32 %v275_v62, %v266_v1  ;;  %v269_v5 = vadd.f32 %v268_v2, %v256_v3 }
  0xd2   :  { %278 = vst.msk [vmem:[#allocation9 + $0x4] sm:$0xf] %vm272_vm5, %v276_v4  ;;  %273 = vst.msk [vmem:[#allocation9] sm:$0xf] %vm272_vm5, %v269_v5 }
  0xd3   :  { %390 = shalt.err (!%p387_p8)
}
  0xd4   :  { %s391_s10 = scalar_lea.hbm %s533_s3, 128 }
  0xd5   :  { %p392_p9 = scmp.ne.s32.totalorder %s533_s3, %s391_s10  ;;  %p395_p10 = scmp.lt.u32.totalorder %s391_s10, %s533_s3 }
  0xd7   :  { %p397_p11 = pnand %p395_p10, %p392_p9 }
  0xd9   :  { %400 = shalt.err (!%p397_p11)
}
  0xda   :  { %s418_s15 = smov 64   ;;  %s419_s16 = smov 4  }
  0xdb   :  { %290 = dma.vmem_to_hbm [thread:$0]  %s285_s7, 128, %s533_s3, [#allocation4], %s418_s15, %s418_s15, %s419_s16  }
  0xdc   :  { %407 = dma.done.wait [#allocation4], 128  }
  0xdd   :  { %408 = vsyncadd [#allocation4], 4294967168 }
  0xde   :  { %294 = vsyncpa [#allocation3], 1 }
  0xdf   :  { %295 = vsyncpa [#allocation4], 1 }
  0xe0   :  { %296 = vsyncpa [#allocation5], 1 }
  0xe1   :  { %297 = vsyncpa [#allocation8], 1 }

</bundles_post_ra>
